<compile_context>
chip_gen: v7x
topology: tpu7x:2x2x1
jax: 0.10.0
libtpu: 0.0.40
codegen_flags: <defaults>
</compile_context>

<pallas_src>
import jax
import jax.numpy as jnp
from jax.experimental import pallas as pl
from jax.experimental.pallas import tpu as pltpu

INPUT_SIZE = 881
HIDDEN = 300
DEFAULT_TM = 1024          # max batch rows per tile (multiple of 8)


def _linear_kernel(x_ref, w_ref, b_ref, o_ref):
    # x_ref: (TM, 881) f32 ; w_ref: (881, 300) bf16|f32 ; b_ref: (1, 300) f32
    # o_ref: (TM, 300) f32
    x = x_ref[...].astype(w_ref.dtype)   # in-kernel MXU-input cast (no wrapper pass)
    acc = jnp.dot(x, w_ref[...], preferred_element_type=jnp.float32)
    o_ref[...] = (acc + b_ref[...]).astype(o_ref.dtype)


def prepare_params(weight, bias, *, dtype=jnp.bfloat16):
    """One-time parameter prep (do NOT call per forward).

    weight: (300, 881) in PyTorch nn.Linear layout; bias: (300,).
    Returns weight pre-transposed to (881, 300) in `dtype` (bf16 default:
    ~3-4x MXU throughput on v5e, half the weight DMA everywhere; pass
    dtype=jnp.float32 for exact nn.Linear numerics) and bias as (1, 300) f32.
    """
    w_t = weight.T.astype(dtype)                                 # (881, 300)
    b_row = bias.astype(jnp.float32).reshape(1, HIDDEN)          # (1, 300)
    return w_t, b_row


def _round_up(n, m):
    return ((n + m - 1) // m) * m


def _pick_tile(batch, tm_max):
    """Pick a batch-tile size (static, from shapes).

    For batch >= 16: an EVEN number of roughly equal tiles so the 'parallel'
    batch axis balances across v7x's two TensorCores; tiles capped at tm_max.
    For tiny batches: one full-batch tile (block dim == array dim is legal).
    """
    if batch < 16:
        return batch
    steps = max(2, 2 * pl.cdiv(batch, 2 * tm_max))
    tm = _round_up(pl.cdiv(batch, steps), 8)
    return min(tm, tm_max)


def encoder_forward(x, w_t, b_row, *, tm_max=DEFAULT_TM):
    """x: (B, 881) f32; w_t: (881, 300) bf16/f32; b_row: (1, 300) f32 -> (B, 300) f32."""
    batch = x.shape[0]
    tm = _pick_tile(batch, tm_max)
    grid = (pl.cdiv(batch, tm),)

    cost = pl.CostEstimate(
        flops=2 * batch * INPUT_SIZE * HIDDEN,
        transcendentals=0,
        bytes_accessed=(x.size * x.dtype.itemsize
                        + w_t.size * w_t.dtype.itemsize
                        + b_row.size * b_row.dtype.itemsize
                        + batch * HIDDEN * 4),
    )

    return pl.pallas_call(
        _linear_kernel,
        out_shape=jax.ShapeDtypeStruct((batch, HIDDEN), jnp.float32),
        grid_spec=pltpu.PrefetchScalarGridSpec(
            num_scalar_prefetch=0,
            grid=grid,
            in_specs=[
                # x: tiled along batch, pipelined (double-buffered) DMA.
                pl.BlockSpec((tm, INPUT_SIZE), lambda i: (i, 0)),
                # weight/bias: constant block index -> VMEM-resident across tiles.
                pl.BlockSpec((INPUT_SIZE, HIDDEN), lambda i: (0, 0)),
                pl.BlockSpec((1, HIDDEN), lambda i: (0, 0)),
            ],
            # Direct (tm, 300) store: no padded output, no wrapper slice pass.
            out_specs=pl.BlockSpec((tm, HIDDEN), lambda i: (i, 0)),
        ),
        compiler_params=pltpu.CompilerParams(
            dimension_semantics=("parallel",),   # megacore-shard the batch axis (v7x)
            vmem_limit_bytes=32 * 1024 * 1024,   # needed on v5e (16 MiB default scoped)
        ),
        cost_estimate=cost,
    )(x, w_t, b_row)


def init_params(key):
    """Deterministic init matching torch.nn.Linear default U(-1/sqrt(in), 1/sqrt(in))."""
    k_w, k_b = jax.random.split(key)
    bound = 1.0 / jnp.sqrt(jnp.float32(INPUT_SIZE))
    weight = jax.random.uniform(
        k_w, (HIDDEN, INPUT_SIZE), jnp.float32, minval=-bound, maxval=bound)
    bias = jax.random.uniform(
        k_b, (HIDDEN,), jnp.float32, minval=-bound, maxval=bound)
    return weight, bias


def _reference(x, weight, bias):
    return jnp.dot(x, weight.T, precision=jax.lax.Precision.HIGHEST) + bias


if __name__ == "__main__":
    key = jax.random.PRNGKey(0)
    k_x, k_x2, k_p = jax.random.split(key, 3)

    weight, bias = init_params(k_p)
    fwd = jax.jit(encoder_forward)

    # Small-shape check (batch=2), consistent with the module spec.
    x = jax.random.normal(k_x, (2, INPUT_SIZE), jnp.float32)
    # Larger batch not divisible by the tile (exercises ragged edge tile +
    # balanced 2-step grid for v7x megacore).
    x2 = jax.random.normal(k_x2, (777, INPUT_SIZE), jnp.float32)
    ref = _reference(x, weight, bias)
    ref2 = _reference(x2, weight, bias)

    # bf16-weight fast path (default prepare_params): f32 accumulation on MXU.
    w_bf16, b_row = prepare_params(weight, bias, dtype=jnp.bfloat16)
    out = jax.block_until_ready(fwd(x, w_bf16, b_row))
    assert out.shape == (2, HIDDEN)
    assert jnp.allclose(out, ref, atol=2e-2, rtol=2e-2)

    out2 = jax.block_until_ready(fwd(x2, w_bf16, b_row))
    assert out2.shape == (777, HIDDEN)
    assert jnp.allclose(out2, ref2, atol=2e-2, rtol=2e-2)

    # Exact f32 path (matches nn.Linear numerics to MXU bf16x3 accuracy).
    w_f32, b_row_f32 = prepare_params(weight, bias, dtype=jnp.float32)
    out3 = jax.block_until_ready(fwd(x2, w_f32, b_row_f32))
    assert out3.shape == (777, HIDDEN)
    assert jnp.allclose(out3, ref2, atol=1e-4, rtol=1e-4)

    print("KERNEL_OK")
</pallas_src>

<mosaic_0001>
module attributes {stable_mosaic.version = 11 : i64} {
  func.func @_linear_kernel(%arg0: i32, %arg1: memref<2x881xf32, #tpu.memory_space<vmem>>, %arg2: memref<881x300xbf16, #tpu.memory_space<vmem>>, %arg3: memref<1x300xf32, #tpu.memory_space<vmem>>, %arg4: memref<2x300xf32, #tpu.memory_space<vmem>>) attributes {dimension_semantics = [#tpu.dimension_semantics<parallel>], iteration_bounds = array<i64: 1>, scalar_prefetch = 0 : i64, scratch_operands = 0 : i64, tpu.core_type = #tpu.core_type<tc>, window_params = [{transform_indices = @transform_0, window_bounds = array<i64: 2, 881>}, {pipeline_mode = #tpu.pipeline_mode<synchronous>, transform_indices = @transform_1, window_bounds = array<i64: 881, 300>}, {pipeline_mode = #tpu.pipeline_mode<synchronous>, transform_indices = @transform_2, window_bounds = array<i64: 1, 300>}, {transform_indices = @transform_3, window_bounds = array<i64: 2, 300>}]} {
    %c0 = arith.constant 0 : index
    %c0_0 = arith.constant 0 : index
    %0 = vector.load %arg1[%c0, %c0_0] : memref<2x881xf32, #tpu.memory_space<vmem>>, vector<2x881xf32>
    %1 = arith.truncf %0 : vector<2x881xf32> to vector<2x881xbf16>
    %c0_1 = arith.constant 0 : index
    %c0_2 = arith.constant 0 : index
    %2 = vector.load %arg2[%c0_1, %c0_2] : memref<881x300xbf16, #tpu.memory_space<vmem>>, vector<881x300xbf16>
    %cst = arith.constant dense<0.000000e+00> : vector<2x300xf32>
    %3 = tpu.matmul %1, %2, %cst {dimension_numbers = #tpu.dot_dimension_numbers<[1], [0], [0], [1], [0, 0, 1, 1], [], []>} : vector<2x881xbf16>, vector<881x300xbf16>, vector<2x300xf32> -> vector<2x300xf32>
    %c0_3 = arith.constant 0 : index
    %c0_4 = arith.constant 0 : index
    %4 = vector.load %arg3[%c0_3, %c0_4] : memref<1x300xf32, #tpu.memory_space<vmem>>, vector<1x300xf32>
    %5 = vector.broadcast %4 : vector<1x300xf32> to vector<2x300xf32>
    %6 = arith.addf %3, %5 : vector<2x300xf32>
    %c0_5 = arith.constant 0 : index
    %c0_6 = arith.constant 0 : index
    %7 = vector.load %arg4[%c0_5, %c0_6] : memref<2x300xf32, #tpu.memory_space<vmem>>, vector<2x300xf32>
    tpu.vector_store %arg4[%c0_5, %c0_6], %6 {strides = array<i32>} : memref<2x300xf32, #tpu.memory_space<vmem>>, vector<2x300xf32>,
    return
  }
  func.func @transform_0(%arg0: i32) -> (i32, i32) {
    %c0_i32 = arith.constant 0 : i32
    %c0_i32_0 = arith.constant 0 : i32
    return %arg0, %c0_i32 : i32, i32
  }
  func.func @transform_1(%arg0: i32) -> (i32, i32) {
    %c0_i32 = arith.constant 0 : i32
    %c0_i32_0 = arith.constant 0 : i32
    %c0_i32_1 = arith.constant 0 : i32
    return %c0_i32, %c0_i32_0 : i32, i32
  }
  func.func @transform_2(%arg0: i32) -> (i32, i32) {
    %c0_i32 = arith.constant 0 : i32
    %c0_i32_0 = arith.constant 0 : i32
    %c0_i32_1 = arith.constant 0 : i32
    return %c0_i32, %c0_i32_0 : i32, i32
  }
  func.func @transform_3(%arg0: i32) -> (i32, i32) {
    %c0_i32 = arith.constant 0 : i32
    %c0_i32_0 = arith.constant 0 : i32
    return %arg0, %c0_i32 : i32, i32
  }
}

</mosaic_0001>

<bundles_post_ra>
// kernel: encoder_forward.1
= control target key start
LH: loop header
LB: loop body
LE: loop exit
PB: predicated region body
PF: predicated region fallthrough
CT: control target
= control target key end

     0   :  { %v2105_v36 = vmov 1983009808   ;;  %v24_v38 = vlaneseq  ;;  %s2693_s0 = inlined_call_operand.vmem [shape: f32[2,881], index: 0, kind: input, shape index: {}]   ;;  %s2694_s1 = inlined_call_operand.vmem [shape: bf16[881,300], index: 1, kind: input, shape index: {}]   ;;  %s2695_s2 = inlined_call_operand.vmem [shape: f32[1,300], index: 2, kind: input, shape index: {}]   ;;  %s2696_s3 = inlined_call_operand.hbm [shape: f32[2,300], index: 3, kind: output, shape index: {}]  }
   0x1   :  { %v1856_v0 = vld [vmem:[%s2694_s1 + $0x4] ss:$12 sps:$4 sm:$0xff]   ;;  %v1860_v2 = vld [vmem:[%s2694_s1] ss:$12 sps:$4 sm:$0xff]   ;;  %v1862_v4 = vld [vmem:[%s2694_s1 + $0x1c] ss:$12 sps:$4 sm:$0xff]   ;;  %v22_v37 = vunpack.c.l.s4 %v2105_v36 }
   0x2   :  { %v1858_v1 = vld [vmem:[%s2694_s1 + $0x184] ss:$12 sps:$4 sm:$0xff]   ;;  %1210 = vmatprep.subr.bf16.mxu1 %v1856_v0  ;;  %v1861_v3 = vld [vmem:[%s2694_s1 + $0x180] ss:$12 sps:$4 sm:$0xff]   ;;  %v1864_v5 = vld [vmem:[%s2694_s1 + $0x19c] ss:$12 sps:$4 sm:$0xff]  }
   0x3   :  { %1251 = vmatprep.subr.bf16.mxu0 %v1858_v1  ;;  %1211 = vmatpush1.bf16.msra.mxu1 %v1860_v2  ;;  %v1866_v6 = vld [vmem:[%s2694_s1 + $0x18] ss:$12 sps:$4 sm:$0xff]   ;;  %v1868_v8 = vld [vmem:[%s2694_s1 + $0x34] ss:$12 sps:$4 sm:$0xff]   ;;  %v1872_v10 = vld [vmem:[%s2694_s1 + $0x30] ss:$12 sps:$4 sm:$0xff]   ;;  %v23_v42 = vunpack.c.0.s8 %v22_v37 }
   0x4   :  { %1252 = vmatpush1.bf16.msra.mxu0 %v1861_v3  ;;  %1212 = vmatprep.subr.bf16.mxu1 %v1862_v4  ;;  %v1867_v7 = vld [vmem:[%s2694_s1 + $0x198] ss:$12 sps:$4 sm:$0xff]   ;;  %v1870_v9 = vld [vmem:[%s2694_s1 + $0x1b4] ss:$12 sps:$4 sm:$0xff]   ;;  %v1873_v11 = vld [vmem:[%s2694_s1 + $0x1b0] ss:$12 sps:$4 sm:$0xff]  }
   0x5   :  { %1253 = vmatprep.subr.bf16.mxu0 %v1864_v5  ;;  %v1874_v12 = vld [vmem:[%s2694_s1 + $0x4c] ss:$12 sps:$4 sm:$0xff]   ;;  %v1878_v14 = vld [vmem:[%s2694_s1 + $0x48] ss:$12 sps:$4 sm:$0xff]   ;;  %v1880_v16 = vld [vmem:[%s2694_s1 + $0x64] ss:$12 sps:$4 sm:$0xff]  }
   0x6   :  { %v1876_v13 = vld [vmem:[%s2694_s1 + $0x1cc] ss:$12 sps:$4 sm:$0xff]   ;;  %v1879_v15 = vld [vmem:[%s2694_s1 + $0x1c8] ss:$12 sps:$4 sm:$0xff]   ;;  %v1882_v17 = vld [vmem:[%s2694_s1 + $0x1e4] ss:$12 sps:$4 sm:$0xff]  }
   0x7   :  { %1213 = vmatpush1.bf16.msra.mxu1 %v1866_v6  ;;  %v1884_v18 = vld [vmem:[%s2694_s1 + $0x60] ss:$12 sps:$4 sm:$0xff]   ;;  %v1886_v20 = vld [vmem:[%s2694_s1 + $0x7c] ss:$12 sps:$4 sm:$0xff]   ;;  %v1890_v22 = vld [vmem:[%s2694_s1 + $0x78] ss:$12 sps:$4 sm:$0xff]  }
   0x8   :  { %1254 = vmatpush1.bf16.msra.mxu0 %v1867_v7  ;;  %1214 = vmatprep.subr.bf16.mxu1 %v1868_v8  ;;  %v1885_v19 = vld [vmem:[%s2694_s1 + $0x1e0] ss:$12 sps:$4 sm:$0xff]   ;;  %v1888_v21 = vld [vmem:[%s2694_s1 + $0x1fc] ss:$12 sps:$4 sm:$0xff]   ;;  %v1891_v23 = vld [vmem:[%s2694_s1 + $0x1f8] ss:$12 sps:$4 sm:$0xff]  }
   0x9   :  { %1255 = vmatprep.subr.bf16.mxu0 %v1870_v9  ;;  %v1892_v24 = vld [vmem:[%s2694_s1 + $0x94] ss:$12 sps:$4 sm:$0xff]   ;;  %v1896_v26 = vld [vmem:[%s2694_s1 + $0x90] ss:$12 sps:$4 sm:$0xff]   ;;  %v1898_v28 = vld [vmem:[%s2694_s1 + $0xac] ss:$12 sps:$4 sm:$0xff]  }
   0xa   :  { %v1894_v25 = vld [vmem:[%s2694_s1 + $0x214] ss:$12 sps:$4 sm:$0xff]   ;;  %v1897_v27 = vld [vmem:[%s2694_s1 + $0x210] ss:$12 sps:$4 sm:$0xff]   ;;  %v1900_v29 = vld [vmem:[%s2694_s1 + $0x22c] ss:$12 sps:$4 sm:$0xff]  }
   0xb   :  { %1215 = vmatpush1.bf16.msra.mxu1 %v1872_v10  ;;  %v1902_v30 = vld [vmem:[%s2694_s1 + $0xa8] ss:$12 sps:$4 sm:$0xff]   ;;  %v1904_v32 = vld [vmem:[%s2694_s1 + $0xc4] ss:$12 sps:$4 sm:$0xff]   ;;  %v1908_v34 = vld [vmem:[%s2694_s1 + $0xc0] ss:$12 sps:$4 sm:$0xff]  }
   0xc   :  { %1256 = vmatpush1.bf16.msra.mxu0 %v1873_v11  ;;  %1216 = vmatprep.subr.bf16.mxu1 %v1874_v12  ;;  %v1903_v31 = vld [vmem:[%s2694_s1 + $0x228] ss:$12 sps:$4 sm:$0xff]   ;;  %v1906_v33 = vld [vmem:[%s2694_s1 + $0x244] ss:$12 sps:$4 sm:$0xff]   ;;  %v1909_v35 = vld [vmem:[%s2694_s1 + $0x240] ss:$12 sps:$4 sm:$0xff]  }
   0xd   :  { %1257 = vmatprep.subr.bf16.mxu0 %v1876_v13  ;;  %v1910_v39 = vld [vmem:[%s2694_s1 + $0xdc] ss:$12 sps:$4 sm:$0xff]   ;;  %v1914_v41 = vld [vmem:[%s2694_s1 + $0xd8] ss:$12 sps:$4 sm:$0xff]   ;;  %v2247_v43 = vshrl.u32 %v24_v38, 7 }
   0xe   :  { %v1912_v40 = vld [vmem:[%s2694_s1 + $0x25c] ss:$12 sps:$4 sm:$0xff]   ;;  %v1915_v44 = vld [vmem:[%s2694_s1 + $0x258] ss:$12 sps:$4 sm:$0xff]   ;;  %v1916_v45 = vld [vmem:[%s2694_s1 + $0xf4] ss:$12 sps:$4 sm:$0xff]  }
   0xf   :  { %1217 = vmatpush1.bf16.msra.mxu1 %v1878_v14  ;;  %v1918_v46 = vld [vmem:[%s2694_s1 + $0x274] ss:$12 sps:$4 sm:$0xff]   ;;  %v1920_v47 = vld [vmem:[%s2694_s1 + $0xf0] ss:$12 sps:$4 sm:$0xff]   ;;  %v2265_v49 = vsub.s32 %v23_v42, %v2247_v43  ;;  %v1922_v50 = vld [vmem:[%s2694_s1 + $0x10c] ss:$12 sps:$4 sm:$0xff]  }
  0x10   :  { %1258 = vmatpush1.bf16.msra.mxu0 %v1879_v15  ;;  %1218 = vmatprep.subr.bf16.mxu1 %v1880_v16  ;;  %v1921_v48 = vld [vmem:[%s2694_s1 + $0x270] ss:$12 sps:$4 sm:$0xff]   ;;  %v1924_v51 = vld [vmem:[%s2694_s1 + $0x28c] ss:$12 sps:$4 sm:$0xff]   ;;  %v1926_v52 = vld [vmem:[%s2694_s1 + $0x108] ss:$12 sps:$4 sm:$0xff]  }
  0x11   :  { %1259 = vmatprep.subr.bf16.mxu0 %v1882_v17  ;;  %v16_v53 = vld [vmem:[%s2693_s0] sm:$0xff]  ;;  %v1927_v54 = vld [vmem:[%s2694_s1 + $0x288] ss:$12 sps:$4 sm:$0xff]   ;;  %v1944_v8 = vld [vmem:[%s2694_s1 + $0x150] ss:$12 sps:$4 sm:$0xff]  }
  0x12   :  { %v27_v55 = vrot.slane %v16_v53, %v2265_v49  ;;  %v20_v56 = vcombine.high %v16_v53, %v16_v53  ;;  %v1928_v57 = vld [vmem:[%s2694_s1 + $0x124] ss:$12 sps:$4 sm:$0xff]   ;;  %v1932_v61 = vld [vmem:[%s2694_s1 + $0x120] ss:$12 sps:$4 sm:$0xff]   ;;  %v1934_v1 = vld [vmem:[%s2694_s1 + $0x13c] ss:$12 sps:$4 sm:$0xff]  }
  0x13   :  { %1219 = vmatpush1.bf16.msra.mxu1 %v1884_v18  ;;  %v1930_v58 = vld [vmem:[%s2694_s1 + $0x2a4] ss:$12 sps:$4 sm:$0xff]   ;;  %v1933_v62 = vld [vmem:[%s2694_s1 + $0x2a0] ss:$12 sps:$4 sm:$0xff]   ;;  %v1936_v2 = vld [vmem:[%s2694_s1 + $0x2bc] ss:$12 sps:$4 sm:$0xff]  }
  0x14   :  { %1260 = vmatpush1.bf16.msra.mxu0 %v1885_v19  ;;  %1220 = vmatprep.subr.bf16.mxu1 %v1886_v20  ;;  %v35_v59 = vcombine.high %v27_v55, %v27_v55  ;;  %v34_v60 = vrot.slane %v20_v56, %v2265_v49  ;;  %v1938_v4 = vld [vmem:[%s2694_s1 + $0x138] ss:$12 sps:$4 sm:$0xff]   ;;  %v1940_v6 = vld [vmem:[%s2694_s1 + $0x154] ss:$12 sps:$4 sm:$0xff]   ;;  %v1945_v9 = vld [vmem:[%s2694_s1 + $0x2d0] ss:$12 sps:$4 sm:$0xff]   ;;  %v2344_v17 = vpack.c.bf16 %v27_v55, %v27_v55 }
  0x15   :  { %1261 = vmatprep.subr.bf16.mxu0 %v1888_v21  ;;  %v1939_v5 = vld [vmem:[%s2694_s1 + $0x2b8] ss:$12 sps:$4 sm:$0xff]   ;;  %v1942_v7 = vld [vmem:[%s2694_s1 + $0x2d4] ss:$12 sps:$4 sm:$0xff]   ;;  %v1960_v20 = vld [vmem:[%s2694_s1 + $0x31c] ss:$12 sps:$4 sm:$0xff]  }
  0x16   :  { %v61_v63 = vpack.c.bf16 %v35_v59, %v35_v59  ;;  %v36_v0 = vcombine.high %v34_v60, %v34_v60  ;;  %v1946_v10 = vld [vmem:[%s2694_s1 + $0x16c] ss:$12 sps:$4 sm:$0xff]   ;;  %v1950_v12 = vld [vmem:[%s2694_s1 + $0x168] ss:$12 sps:$4 sm:$0xff]   ;;  %v1955_v14 = vld [vmem:[%s2694_s1 + $0x304] ss:$12 sps:$4 sm:$0xff]   ;;  %v2346_v18 = vpack.c.bf16 %v34_v60, %v34_v60 }
  0x17   :  { %1221 = vmatpush1.bf16.msra.mxu1 %v1890_v22  ;;  %v1948_v11 = vld [vmem:[%s2694_s1 + $0x2ec] ss:$12 sps:$4 sm:$0xff]   ;;  %v1951_v13 = vld [vmem:[%s2694_s1 + $0x2e8] ss:$12 sps:$4 sm:$0xff]   ;;  %v1983_v42 = vld [vmem:[%s2694_s1 + $0x390] ss:$12 sps:$4 sm:$0xff]  }
  0x18   :  { %1262 = vmatpush1.bf16.msra.mxu0 %v1891_v23  ;;  %1222 = vmatprep.subr.bf16.mxu1 %v1892_v24  ;;  %v2302_v3 = vpack.c.bf16 %v36_v0, %v36_v0  ;;  %v1956_v15 = vld [vmem:[%s2694_s1 + $0xc8] ss:$12 sps:$4 sm:$0xff]   ;;  %v1953_v16 = vld [vmem:[%s2694_s1 + $0x300] ss:$12 sps:$4 sm:$0xff]   ;;  %v1958_v22 = vld [vmem:[%s2694_s1 + $0x318] ss:$12 sps:$4 sm:$0xff]  }
  0x19   :  { %1263 = vmatprep.subr.bf16.mxu0 %v1894_v25  ;;  %1242 = vmatprep.mubr.bf16.mxu1 %v61_v63  ;;  %v1957_v19 = vld [vmem:[%s2694_s1 + $0x8] ss:$12 sps:$4 sm:$0xff]   ;;  %v1961_v21 = vld [vmem:[%s2694_s1 + $0xe0] ss:$12 sps:$4 sm:$0xff]   ;;  %v1966_v25 = vld [vmem:[%s2694_s1 + $0xf8] ss:$12 sps:$4 sm:$0xff]  }
  0x1a   :  { %1283 = vmatprep.mubr.bf16.mxu0 %v2302_v3  ;;  %v1962_v23 = vld [vmem:[%s2694_s1 + $0x20] ss:$12 sps:$4 sm:$0xff]   ;;  %v1980_v36 = vld [vmem:[%s2694_s1 + $0x37c] ss:$12 sps:$4 sm:$0xff]   ;;  %v1978_v38 = vld [vmem:[%s2694_s1 + $0x378] ss:$12 sps:$4 sm:$0xff]  }
  0x1b   :  { %1223 = vmatpush1.bf16.msra.mxu1 %v1896_v26  ;;  %v1965_v24 = vld [vmem:[%s2694_s1 + $0x334] ss:$12 sps:$4 sm:$0xff]   ;;  %v1963_v26 = vld [vmem:[%s2694_s1 + $0x330] ss:$12 sps:$4 sm:$0xff]  }
  0x1c   :  { %1264 = vmatpush1.bf16.msra.mxu0 %v1897_v27  ;;  %1224 = vmatprep.subr.bf16.mxu1 %v1898_v28  ;;  %v1967_v27 = vld [vmem:[%s2694_s1 + $0x38] ss:$12 sps:$4 sm:$0xff]   ;;  %v1981_v37 = vld [vmem:[%s2694_s1 + $0x140] ss:$12 sps:$4 sm:$0xff]   ;;  %v1997_v53 = vld [vmem:[%s2694_s1 + $0x188] ss:$12 sps:$4 sm:$0xff]  }
  0x1d   :  { %1265 = vmatprep.subr.bf16.mxu0 %v1900_v29  ;;  %v1970_v28 = vld [vmem:[%s2694_s1 + $0x34c] ss:$12 sps:$4 sm:$0xff]   ;;  %v1971_v29 = vld [vmem:[%s2694_s1 + $0x110] ss:$12 sps:$4 sm:$0xff]  }
  0x1e   :  { %v2000_v55 = vld [vmem:[%s2694_s1 + $0x3dc] ss:$12 sps:$4 sm:$0xff]   ;;  %v2001_v56 = vld [vmem:[%s2694_s1 + $0x260] ss:$12 sps:$4 sm:$0xff]  }
  0x1f   :  { %1225 = vmatpush1.bf16.msra.mxu1 %v1902_v30  ;;  %v1968_v30 = vld [vmem:[%s2694_s1 + $0x348] ss:$12 sps:$4 sm:$0xff]   ;;  %v2002_v59 = vld [vmem:[%s2694_s1 + $0x1a0] ss:$12 sps:$4 sm:$0xff]   ;;  %v2003_v0 = vld [vmem:[%s2694_s1 + $0x3f0] ss:$12 sps:$4 sm:$0xff]  }
  0x20   :  { %1266 = vmatpush1.bf16.msra.mxu0 %v1903_v31  ;;  %1226 = vmatprep.subr.bf16.mxu1 %v1904_v32  ;;  %v1972_v31 = vld [vmem:[%s2694_s1 + $0x50] ss:$12 sps:$4 sm:$0xff]  }
  0x21   :  { %1267 = vmatprep.subr.bf16.mxu0 %v1906_v33  ;;  %v1975_v32 = vld [vmem:[%s2694_s1 + $0x364] ss:$12 sps:$4 sm:$0xff]   ;;  %v1976_v33 = vld [vmem:[%s2694_s1 + $0x128] ss:$12 sps:$4 sm:$0xff]  }
  0x23   :  { %1227 = vmatpush1.bf16.msra.mxu1 %v1908_v34  ;;  %v1973_v34 = vld [vmem:[%s2694_s1 + $0x360] ss:$12 sps:$4 sm:$0xff]  }
  0x24   :  { %1268 = vmatpush1.bf16.msra.mxu0 %v1909_v35  ;;  %1228 = vmatprep.subr.bf16.mxu1 %v1910_v39  ;;  %v1977_v35 = vld [vmem:[%s2694_s1 + $0x68] ss:$12 sps:$4 sm:$0xff]   ;;  %v1982_v39 = vld [vmem:[%s2694_s1 + $0x80] ss:$12 sps:$4 sm:$0xff]  }
  0x25   :  { %1269 = vmatprep.subr.bf16.mxu0 %v1912_v40  ;;  %v1985_v40 = vld [vmem:[%s2694_s1 + $0x394] ss:$12 sps:$4 sm:$0xff]  }
  0x27   :  { %1229 = vmatpush1.bf16.msra.mxu1 %v1914_v41  ;;  %v1986_v41 = vld [vmem:[%s2694_s1 + $0x158] ss:$12 sps:$4 sm:$0xff]  }
  0x28   :  { %1270 = vmatpush1.bf16.msra.mxu0 %v1915_v44  ;;  %1230 = vmatprep.subr.bf16.mxu1 %v1916_v45  ;;  %v1987_v44 = vld [vmem:[%s2694_s1 + $0x98] ss:$12 sps:$4 sm:$0xff]  }
  0x29   :  { %1271 = vmatprep.subr.bf16.mxu0 %v1918_v46  ;;  %v1990_v45 = vld [vmem:[%s2694_s1 + $0x3ac] ss:$12 sps:$4 sm:$0xff]   ;;  %v1991_v46 = vld [vmem:[%s2694_s1 + $0x170] ss:$12 sps:$4 sm:$0xff]  }
  0x2b   :  { %1231 = vmatpush1.bf16.msra.mxu1 %v1920_v47  ;;  %v1988_v47 = vld [vmem:[%s2694_s1 + $0x3a8] ss:$12 sps:$4 sm:$0xff]  }
  0x2c   :  { %1272 = vmatpush1.bf16.msra.mxu0 %v1921_v48  ;;  %1232 = vmatprep.subr.bf16.mxu1 %v1922_v50  ;;  %v1992_v48 = vld [vmem:[%s2694_s1 + $0xb0] ss:$12 sps:$4 sm:$0xff]  }
  0x2d   :  { %1273 = vmatprep.subr.bf16.mxu0 %v1924_v51  ;;  %v1995_v50 = vld [vmem:[%s2694_s1 + $0x3c4] ss:$12 sps:$4 sm:$0xff]   ;;  %v1996_v51 = vld [vmem:[%s2694_s1 + $0x248] ss:$12 sps:$4 sm:$0xff]  }
  0x2f   :  { %1233 = vmatpush1.bf16.msra.mxu1 %v1926_v52  ;;  %v1993_v52 = vld [vmem:[%s2694_s1 + $0x3c0] ss:$12 sps:$4 sm:$0xff]  }
  0x30   :  { %1274 = vmatpush1.bf16.msra.mxu0 %v1927_v54  ;;  %1234 = vmatprep.subr.bf16.mxu1 %v1928_v57  ;;  %v2452_v54 = vld [vmem:[%s2693_s0 + $0x8] sm:$0x3f] }
  0x31   :  { %1275 = vmatprep.subr.bf16.mxu0 %v1930_v58  ;;  %v44_v57 = vrot.slane %v2452_v54, %v2265_v49  ;;  %v1998_v58 = vld [vmem:[%s2694_s1 + $0x3d8] ss:$12 sps:$4 sm:$0xff]  }
  0x33   :  { %1235 = vmatpush1.bf16.msra.mxu1 %v1932_v61  ;;  %v52_v60 = vcombine.high %v44_v57, %v44_v57  ;;  %v2005_v61 = vld [vmem:[%s2694_s1 + $0x3f4] ss:$12 sps:$4 sm:$0xff]  }
  0x34   :  { %1276 = vmatpush1.bf16.msra.mxu0 %v1933_v62  ;;  %1236 = vmatprep.subr.bf16.mxu1 %v1934_v1  ;;  %v2006_v62 = vld [vmem:[%s2694_s1 + $0x278] ss:$12 sps:$4 sm:$0xff]  }
  0x35   :  { %1277 = vmatprep.subr.bf16.mxu0 %v1936_v2  ;;  %v2007_v1 = vld [vmem:[%s2694_s1 + $0x1b8] ss:$12 sps:$4 sm:$0xff]  }
  0x36   :  { %v2010_v2 = vld [vmem:[%s2694_s1 + $0x40c] ss:$12 sps:$4 sm:$0xff]  }
  0x37   :  { %1237 = vmatpush1.bf16.msra.mxu1 %v1938_v4  ;;  %v2008_v4 = vld [vmem:[%s2694_s1 + $0x408] ss:$12 sps:$4 sm:$0xff]  }
  0x38   :  { %1278 = vmatpush1.bf16.msra.mxu0 %v1939_v5  ;;  %1238 = vmatprep.subr.bf16.mxu1 %v1940_v6  ;;  %v2012_v5 = vld [vmem:[%s2694_s1 + $0x1d0] ss:$12 sps:$4 sm:$0xff]  }
  0x39   :  { %1279 = vmatprep.subr.bf16.mxu0 %v1942_v7  ;;  %v2015_v6 = vld [vmem:[%s2694_s1 + $0x424] ss:$12 sps:$4 sm:$0xff]   ;;  %v2016_v7 = vld [vmem:[%s2694_s1 + $0x2a8] ss:$12 sps:$4 sm:$0xff]  }
  0x3b   :  { %1239 = vmatpush1.bf16.msra.mxu1 %v1944_v8  ;;  %v2013_v8 = vld [vmem:[%s2694_s1 + $0x420] ss:$12 sps:$4 sm:$0xff]  }
  0x3c   :  { %1280 = vmatpush1.bf16.msra.mxu0 %v1945_v9  ;;  %1240 = vmatprep.subr.bf16.mxu1 %v1946_v10  ;;  %v2017_v9 = vld [vmem:[%s2694_s1 + $0x1e8] ss:$12 sps:$4 sm:$0xff]  }
  0x3d   :  { %1281 = vmatprep.subr.bf16.mxu0 %v1948_v11  ;;  %v2020_v10 = vld [vmem:[%s2694_s1 + $0x43c] ss:$12 sps:$4 sm:$0xff]   ;;  %v2021_v11 = vld [vmem:[%s2694_s1 + $0x2c0] ss:$12 sps:$4 sm:$0xff]  }
  0x3f   :  { %1241 = vmatpush1.bf16.msra.mxu1 %v1950_v12  ;;  %v2018_v12 = vld [vmem:[%s2694_s1 + $0x438] ss:$12 sps:$4 sm:$0xff]  }
  0x40   :  { %1282 = vmatpush1.bf16.msra.mxu0 %v1951_v13  ;;  %1744 = vmatprep.subr.bf16.mxu1 %v1956_v15  ;;  %v2022_v13 = vld [vmem:[%s2694_s1 + $0x200] ss:$12 sps:$4 sm:$0xff]   ;;  %v2026_v15 = vld [vmem:[%s2694_s1 + $0x2d8] ss:$12 sps:$4 sm:$0xff]  }
  0x41   :  { %1292 = vmatprep.subr.bf16.mxu0 %v1955_v14  ;;  %v2025_v14 = vld [vmem:[%s2694_s1 + $0x454] ss:$12 sps:$4 sm:$0xff]  }
  0x42   :  { %1243 = vmatmul.mubr.bf16.vlgmr.msra.gmra.mrb[0].mxu1 %v2344_v17 }
  0x43   :  { %1284 = vmatmul.mubr.bf16.vlgmr.msra.gmra.mrb[0].mxu0 %v2346_v18  ;;  %1745 = vmatpush3.bf16.msra.mxu1 %v1957_v19  ;;  %v2030_v19 = vld [vmem:[%s2694_s1 + $0x46c] ss:$12 sps:$4 sm:$0xff]  }
  0x44   :  { %1293 = vmatpush1.bf16.msra.mxu0 %v1953_v16  ;;  %1746 = vmatprep.subr.bf16.mxu1 %v1961_v21  ;;  %v2023_v16 = vld [vmem:[%s2694_s1 + $0x450] ss:$12 sps:$4 sm:$0xff]   ;;  %v2028_v21 = vld [vmem:[%s2694_s1 + $0x468] ss:$12 sps:$4 sm:$0xff]  }
  0x45   :  { %1294 = vmatprep.subr.bf16.mxu0 %v1960_v20  ;;  %1406 = vmatprep.mubr.bf16.mxu1 %v61_v63  ;;  %v2475_v63 = vpack.c.bf16 %v52_v60, %v52_v60  ;;  %v2031_v20 = vld [vmem:[%s2694_s1 + $0x2f0] ss:$12 sps:$4 sm:$0xff]  }
  0x47   :  { %1747 = vmatpush3.bf16.msra.mxu1 %v1962_v23  ;;  %1324 = vmatprep.mubr.bf16.mxu0 %v2475_v63  ;;  %v2036_v23 = vld [vmem:[%s2694_s1 + $0x484] ss:$12 sps:$4 sm:$0xff]  }
  0x48   :  { %1295 = vmatpush1.bf16.msra.mxu0 %v1958_v22  ;;  %1748 = vmatprep.subr.bf16.mxu1 %v1966_v25  ;;  %v2032_v22 = vld [vmem:[%s2694_s1 + $0x230] ss:$12 sps:$4 sm:$0xff]   ;;  %v2034_v25 = vld [vmem:[%s2694_s1 + $0x480] ss:$12 sps:$4 sm:$0xff]  }
  0x49   :  { %1296 = vmatprep.subr.bf16.mxu0 %v1965_v24  ;;  %v2037_v24 = vld [vmem:[%s2694_s1 + $0x3c8] ss:$12 sps:$4 sm:$0xff]  }
  0x4b   :  { %1749 = vmatpush3.bf16.msra.mxu1 %v1967_v27  ;;  %v2038_v27 = vld [vmem:[%s2694_s1 + $0x308] ss:$12 sps:$4 sm:$0xff]  }
  0x4c   :  { %1297 = vmatpush1.bf16.msra.mxu0 %v1963_v26  ;;  %1750 = vmatprep.subr.bf16.mxu1 %v1971_v29  ;;  %v2554_v26 = vpack.c.bf16 %v44_v57, %v44_v57  ;;  %v2042_v29 = vld [vmem:[%s2694_s1 + $0x3e0] ss:$12 sps:$4 sm:$0xff]  }
  0x4d   :  { %1298 = vmatprep.subr.bf16.mxu0 %v1970_v28  ;;  %v2041_v28 = vld [vmem:[%s2694_s1 + $0x49c] ss:$12 sps:$4 sm:$0xff]  }
  0x4f   :  { %1751 = vmatpush3.bf16.msra.mxu1 %v1972_v31 }
  0x50   :  { %1299 = vmatpush1.bf16.msra.mxu0 %v1968_v30  ;;  %1752 = vmatprep.subr.bf16.mxu1 %v1976_v33 }
  0x51   :  { %1300 = vmatprep.subr.bf16.mxu0 %v1975_v32 }
  0x53   :  { %1753 = vmatpush3.bf16.msra.mxu1 %v1977_v35 }
  0x54   :  { %1301 = vmatpush1.bf16.msra.mxu0 %v1973_v34  ;;  %1754 = vmatprep.subr.bf16.mxu1 %v1981_v37 }
  0x55   :  { %1302 = vmatprep.subr.bf16.mxu0 %v1980_v36 }
  0x57   :  { %1755 = vmatpush3.bf16.msra.mxu1 %v1982_v39 }
  0x58   :  { %1303 = vmatpush1.bf16.msra.mxu0 %v1978_v38  ;;  %1756 = vmatprep.subr.bf16.mxu1 %v1986_v41 }
  0x59   :  { %1304 = vmatprep.subr.bf16.mxu0 %v1985_v40 }
  0x5b   :  { %1757 = vmatpush3.bf16.msra.mxu1 %v1987_v44 }
  0x5c   :  { %1305 = vmatpush1.bf16.msra.mxu0 %v1983_v42  ;;  %1758 = vmatprep.subr.bf16.mxu1 %v1991_v46 }
  0x5d   :  { %1306 = vmatprep.subr.bf16.mxu0 %v1990_v45 }
  0x5f   :  { %1759 = vmatpush3.bf16.msra.mxu1 %v1992_v48 }
  0x60   :  { %1307 = vmatpush1.bf16.msra.mxu0 %v1988_v47  ;;  %1766 = vmatprep.subr.bf16.mxu1 %v1996_v51 }
  0x61   :  { %1308 = vmatprep.subr.bf16.mxu0 %v1995_v50 }
  0x62   :  { %1407 = vmatmul.mubr.bf16.vlgmr.msra.gmra.mrb[4].mxu1 %v2344_v17  ;;  %v2027_v17 = vld [vmem:[%s2694_s1 + $0x218] ss:$12 sps:$4 sm:$0xff]  }
  0x63   :  { %1767 = vmatpush3.bf16.msra.mxu1 %v1997_v53  ;;  %1446 = vmatprep.mubr.bf16.mxu1 %v2302_v3  ;;  %v2011_v3 = vld [vmem:[%s2694_s1 + $0x290] ss:$12 sps:$4 sm:$0xff]  }
  0x64   :  { %1309 = vmatpush1.bf16.msra.mxu0 %v1993_v52  ;;  %1768 = vmatprep.subr.bf16.mxu1 %v2001_v56 }
  0x65   :  { %1310 = vmatprep.subr.bf16.mxu0 %v2000_v55 }
  0x67   :  { %1769 = vmatpush3.bf16.msra.mxu1 %v2002_v59 }
  0x68   :  { %1311 = vmatpush1.bf16.msra.mxu0 %v1998_v58  ;;  %1770 = vmatprep.subr.bf16.mxu1 %v2006_v62 }
  0x69   :  { %1312 = vmatprep.subr.bf16.mxu0 %v2005_v61 }
  0x6b   :  { %1771 = vmatpush3.bf16.msra.mxu1 %v2007_v1 }
  0x6c   :  { %1313 = vmatpush1.bf16.msra.mxu0 %v2003_v0  ;;  %1772 = vmatprep.subr.bf16.mxu1 %v2011_v3 }
  0x6d   :  { %1314 = vmatprep.subr.bf16.mxu0 %v2010_v2 }
  0x6f   :  { %1773 = vmatpush3.bf16.msra.mxu1 %v2012_v5 }
  0x70   :  { %1315 = vmatpush1.bf16.msra.mxu0 %v2008_v4  ;;  %1774 = vmatprep.subr.bf16.mxu1 %v2016_v7 }
  0x71   :  { %1316 = vmatprep.subr.bf16.mxu0 %v2015_v6 }
  0x73   :  { %1775 = vmatpush3.bf16.msra.mxu1 %v2017_v9 }
  0x74   :  { %1317 = vmatpush1.bf16.msra.mxu0 %v2013_v8  ;;  %1776 = vmatprep.subr.bf16.mxu1 %v2021_v11 }
  0x75   :  { %1318 = vmatprep.subr.bf16.mxu0 %v2020_v10 }
  0x77   :  { %1777 = vmatpush3.bf16.msra.mxu1 %v2022_v13 }
  0x78   :  { %1319 = vmatpush1.bf16.msra.mxu0 %v2018_v12  ;;  %1778 = vmatprep.subr.bf16.mxu1 %v2026_v15 }
  0x79   :  { %1320 = vmatprep.subr.bf16.mxu0 %v2025_v14 }
  0x7b   :  { %1779 = vmatpush3.bf16.msra.mxu1 %v2027_v17 }
  0x7c   :  { %1321 = vmatpush1.bf16.msra.mxu0 %v2023_v16  ;;  %1780 = vmatprep.subr.bf16.mxu1 %v2031_v20 }
  0x7d   :  { %1322 = vmatprep.subr.bf16.mxu0 %v2030_v19 }
  0x7f   :  { %1781 = vmatpush3.bf16.msra.mxu1 %v2032_v22 }
  0x80   :  { %1323 = vmatpush1.bf16.msra.mxu0 %v2028_v21  ;;  %1788 = vmatprep.subr.bf16.mxu1 %v2037_v24 }
  0x81   :  { %1333 = vmatprep.subr.bf16.mxu0 %v2036_v23 }
  0x82   :  { %8 = vsyncpa [#allocation3], 0  ;;  %1447 = vmatmul.mubr.bf16.vlgmr.msra.gmra.mrb[8].mxu1 %v2346_v18  ;;  %v2039_v30 = vld [vmem:[%s2694_s1 + $0x498] ss:$12 sps:$4 sm:$0xff]   ;;  %v2043_v31 = vld [vmem:[%s2694_s1 + $0x320] ss:$12 sps:$4 sm:$0xff]   ;;  %v37_v56 = vcombine.high %v2452_v54, %v2452_v54 }
  0x83   :  { %1325 = vmatmul.mubr.bf16.vlgmr.msra.gmra.mrb[0].mxu0 %v2554_v26  ;;  %1789 = vmatpush3.bf16.msra.mxu1 %v2038_v27  ;;  %v2046_v32 = vld [vmem:[%s2694_s1 + $0x4b4] ss:$12 sps:$4 sm:$0xff]   ;;  %v2047_v18 = vld [vmem:[%s2694_s1 + $0x3f8] ss:$12 sps:$4 sm:$0xff]   ;;  %v2106_v33 = vmov 0   ;;  %vm1198_vm0 = vcmask 1040384  }
  0x84   :  { %1334 = vmatpush1.bf16.msra.mxu0 %v2034_v25  ;;  %1790 = vmatprep.subr.bf16.mxu1 %v2042_v29  ;;  %v2044_v34 = vld [vmem:[%s2694_s1 + $0x4b0] ss:$12 sps:$4 sm:$0xff]   ;;  %v2048_v35 = vld [vmem:[%s2694_s1 + $0x338] ss:$12 sps:$4 sm:$0xff]   ;;  %v2049_v38 = vld [vmem:[%s2694_s1 + $0x4c8] ss:$12 sps:$4 sm:$0xff]   ;;  %v51_v54 = vrot.slane %v37_v56, %v2265_v49 }
  0x85   :  { %1335 = vmatprep.subr.bf16.mxu0 %v2041_v28  ;;  %1365 = vmatprep.mubr.bf16.mxu0 %v2106_v33  ;;  %v2051_v36 = vld [vmem:[%s2694_s1 + $0x4cc] ss:$12 sps:$4 sm:$0xff]   ;;  %v2052_v37 = vld [vmem:[%s2694_s1 + $0x410] ss:$12 sps:$4 sm:$0xff]   ;;  %v2057_v41 = vld [vmem:[%s2694_s1 + $0x428] ss:$12 sps:$4 sm:$0xff]  }
  0x86   :  { %1486 = vmatprep.mubr.bf16.mxu1 %v2475_v63  ;;  %v2053_v39 = vld [vmem:[%s2694_s1 + $0x350] ss:$12 sps:$4 sm:$0xff]   ;;  %v2054_v42 = vld [vmem:[%s2694_s1 + $0x4e0] ss:$12 sps:$4 sm:$0xff]   ;;  %v2058_v44 = vld [vmem:[%s2694_s1 + $0x368] ss:$12 sps:$4 sm:$0xff]   ;;  %v66_v0 = vpack.c.bf16 %v51_v54, %v51_v54 }
  0x87   :  { %1791 = vmatpush3.bf16.msra.mxu1 %v2043_v31  ;;  %v2056_v40 = vld [vmem:[%s2694_s1 + $0x4e4] ss:$12 sps:$4 sm:$0xff]   ;;  %v2061_v45 = vld [vmem:[%s2694_s1 + $0x4fc] ss:$12 sps:$4 sm:$0xff]   ;;  %v2062_v46 = vld [vmem:[%s2694_s1 + $0x440] ss:$12 sps:$4 sm:$0xff]  }
  0x88   :  { %1336 = vmatpush1.bf16.msra.mxu0 %v2039_v30  ;;  %1792 = vmatprep.subr.bf16.mxu1 %v2047_v18  ;;  %v287_v47 = vld [vmem:[%s2694_s1 + $0x528] sm:$0x11]  ;;  %v2059_v48 = vld [vmem:[%s2694_s1 + $0x4f8] ss:$12 sps:$4 sm:$0xff]   ;;  %v2066_v51 = vld [vmem:[%s2694_s1 + $0x514] ss:$12 sps:$4 sm:$0xff]  }
  0x89   :  { %1337 = vmatprep.subr.bf16.mxu0 %v2046_v32  ;;  %v2063_v50 = vld [vmem:[%s2694_s1 + $0x380] ss:$12 sps:$4 sm:$0xff]   ;;  %v2067_v52 = vld [vmem:[%s2694_s1 + $0x458] ss:$12 sps:$4 sm:$0xff]   ;;  %v1740_v53 = vcombine.high %v287_v47, %v287_v47  ;;  %v1200_v55 = vsel %vm1198_vm0, 65535, %v2106_v33  ;;  %v1739_v59 = vcombine.low %v287_v47, %v287_v47  ;;  %vm1194_vm1 = vcmask 924672  }
  0x8a   :  { %v2064_v57 = vld [vmem:[%s2694_s1 + $0x510] ss:$12 sps:$4 sm:$0xff]   ;;  %v2068_v58 = vld [vmem:[%s2694_s1 + $0x398] ss:$12 sps:$4 sm:$0xff]   ;;  %v2073_v1 = vld [vmem:[%s2694_s1 + $0x488] ss:$12 sps:$4 sm:$0xff]  }
  0x8b   :  { %1793 = vmatpush3.bf16.msra.mxu1 %v2048_v35  ;;  %v1205_v60 = vand.u32 %v1740_v53, %v1200_v55  ;;  %v2071_v61 = vld [vmem:[%s2694_s1 + $0x470] ss:$12 sps:$4 sm:$0xff]   ;;  %v1202_v62 = vand.u32 %v1739_v59, %v1200_v55  ;;  %v2107_v2 = vmov 0.0   ;;  %v2074_v3 = vld [vmem:[%s2694_s1 + $0x4a0] ss:$12 sps:$4 sm:$0xff]   ;;  %vm2108_vm2 = vmmov 0  }
  0x8c   :  { %1338 = vmatpush1.bf16.msra.mxu0 %v2044_v34  ;;  %1794 = vmatprep.subr.bf16.mxu1 %v2052_v37  ;;  %v2072_v63 = vld [vmem:[%s2694_s1 + $0x3b0] ss:$12 sps:$4 sm:$0xff]   ;;  %v2075_v4 = vld [vmem:[%s2694_s1 + $0x4b8] ss:$12 sps:$4 sm:$0xff]   ;;  %v2077_v6 = vld [vmem:[%s2694_s1 + $0x4e8] ss:$12 sps:$4 sm:$0xff]  }
  0x8d   :  { %1339 = vmatprep.subr.bf16.mxu0 %v2051_v36  ;;  %v2076_v5 = vld [vmem:[%s2694_s1 + $0x4d0] ss:$12 sps:$4 sm:$0xff]   ;;  %v2078_v7 = vld [vmem:[%s2694_s1 + $0x500] ss:$12 sps:$4 sm:$0xff]   ;;  %v2079_v8 = vld [vmem:[%s2694_s1 + $0x518] ss:$12 sps:$4 sm:$0xff]  }
  0x8e   :  { %v2080_v9 = vld [vmem:[%s2694_s1 + $0x530] ss:$0 sps:$4 sm:$0x11]   ;;  %v301_v21 = vsub.s32 2, %v2247_v43  ;;  %v289_v22 = vld [vmem:[%s2695_s2] sm:$0x7] }
  0x8f   :  { %1795 = vmatpush3.bf16.msra.mxu1 %v2053_v39  ;;  %v1208_v10 = vand.u32 %v2080_v9, %v1200_v55  ;;  %v293_v31 = vsub.s32 0, %v2247_v43  ;;  %v297_v32 = vsub.s32 1, %v2247_v43  ;;  %vm1554_vm3 = vcmask 1041408   ;;  %s2109_s2 = smov [#allocation2]  }
  0x90   :  { %1340 = vmatpush1.bf16.msra.mxu0 %v2049_v38  ;;  %1796 = vmatprep.subr.bf16.mxu1 %v2057_v41  ;;  %v302_v23 = vrot.slane %v289_v22, %v301_v21  ;;  %vm1555_vm4 = vcmask 1043458   ;;  %vm1557_vm6 = vcmask 357380   ;;  %s1566_s22 = sshll.u32 %s2109_s2, 4  ;;  %s1567_s22 = int_to_ptr.vmem [resolvable:$true] %s1566_s22 }
  0x91   :  { %1341 = vmatprep.subr.bf16.mxu0 %v2056_v40  ;;  %v294_v18 = vrot.slane %v289_v22, %v293_v31  ;;  %v298_v33 = vrot.slane %v289_v22, %v297_v32  ;;  %vm1556_vm5 = vmor %vm1555_vm4, %vm1554_vm3  ;;  %s2081_s23 = scalar_lea.vmem %s1567_s22, 96  ;;  %p2086_p1 = scmp.lt.s32.totalorder %s1567_s22, %s1567_s22 }
  0x92   :  { %vm1558_vm7 = vmor %vm1557_vm6, %vm1556_vm5  ;;  %p2082_p0 = scmp.ne.s32.totalorder %s1567_s22, %s2081_s23  ;;  %p2087_p2 = scmp.lt.s32.totalorder %s2081_s23, %s2081_s23 }
  0x93   :  { %1797 = vmatpush3.bf16.msra.mxu1 %v2058_v44 }
  0x94   :  { %1342 = vmatpush1.bf16.msra.mxu0 %v2054_v42  ;;  %1798 = vmatprep.subr.bf16.mxu1 %v2062_v46  ;;  %p2088_p3 = por %p2087_p2, %p2086_p1 }
  0x95   :  { %1343 = vmatprep.subr.bf16.mxu0 %v2061_v45 }
  0x96   :  { %p2089_p4 = pnand %p2088_p3, %p2082_p0 }
  0x97   :  { %1799 = vmatpush3.bf16.msra.mxu1 %v2063_v50 }
  0x98   :  { %1344 = vmatpush1.bf16.msra.mxu0 %v2059_v48  ;;  %1800 = vmatprep.subr.bf16.mxu1 %v2067_v52 }
  0x99   :  { %1345 = vmatprep.subr.bf16.mxu0 %v2066_v51 }
  0x9b   :  { %1801 = vmatpush3.bf16.msra.mxu1 %v2068_v58 }
  0x9c   :  { %1346 = vmatpush1.bf16.msra.mxu0 %v2064_v57  ;;  %1802 = vmatprep.subr.bf16.mxu1 %v2071_v61 }
  0x9d   :  { %1347 = vmatprep.subr.bf16.mxu0 %v1205_v60 }
  0x9f   :  { %1803 = vmatpush3.bf16.msra.mxu1 %v2072_v63 }
  0xa0   :  { %1348 = vmatpush1.bf16.msra.mxu0 %v1202_v62  ;;  %1819 = vmatprep.subr.bf16.mxu1 %v2107_v2 }
  0xa2   :  { %1487 = vmatmul.mubr.bf16.vlgmr.msra.gmra.mrb[12].mxu1 %v2554_v26 }
  0xa3   :  { %1742 = vmatmul.mubr.msk.bf16.vlgmr.msra.gmra.mrb[0].mxu0 %vm1194_vm1, %v66_v0  ;;  %1820 = vmatpush3.bf16.msra.mxu1 %v2073_v1 }
  0xa4   :  { %1835 = vmatprep.mubr.msk.bf16.mxu1 %vm2108_vm2, %v2107_v2  ;;  %1821 = vmatprep.subr.bf16.mxu1 %v2107_v2 }
  0xa7   :  { %1822 = vmatpush3.bf16.msra.mxu1 %v2074_v3 }
  0xa8   :  { %1823 = vmatprep.subr.bf16.mxu1 %v2107_v2 }
  0xab   :  { %1824 = vmatpush3.bf16.msra.mxu1 %v2075_v4 }
  0xac   :  { %1825 = vmatprep.subr.bf16.mxu1 %v2107_v2 }
  0xaf   :  { %1826 = vmatpush3.bf16.msra.mxu1 %v2076_v5 }
  0xb0   :  { %1827 = vmatprep.subr.bf16.mxu1 %v2107_v2 }
  0xb3   :  { %1828 = vmatpush3.bf16.msra.mxu1 %v2077_v6 }
  0xb4   :  { %1829 = vmatprep.subr.bf16.mxu1 %v2107_v2 }
  0xb7   :  { %1830 = vmatpush3.bf16.msra.mxu1 %v2078_v7 }
  0xb8   :  { %1831 = vmatprep.subr.bf16.mxu1 %v2107_v2 }
  0xbb   :  { %1832 = vmatpush3.bf16.msra.mxu1 %v2079_v8 }
  0xbc   :  { %1833 = vmatprep.subr.bf16.mxu1 %v2107_v2 }
  0xbf   :  { %1834 = vmatpush3.bf16.msra.mxu1 %v1208_v10 }
  0xc2   :  { %1836 = vmatmul.mubr.msk.bf16.vlgmr.msra.gmra.mrb[16].mxu1 %vm1194_vm1, %v66_v0 }
 0x115   :  { %v1244_v11 = vpop.f32.mrb[0].mxu1 }
 0x116   :  { %v1246_v12 = vpop.f32.mrb[1].mxu1  ;;  %v1245_v34 = vadd.f32 %v1244_v11, %v294_v18 }
 0x117   :  { %v1248_v13 = vpop.f32.mrb[2].mxu1  ;;  %v1247_v35 = vadd.f32 %v1246_v12, %v298_v33 }
 0x118   :  { %v1249_v14 = vpop.f32.mrb[3].mxu1 }
 0x135   :  { %v1760_v15 = vpop.f32.mrb[4].mxu1 }
 0x136   :  { %v1761_v16 = vpop.f32.mrb[5].mxu1 }
 0x137   :  { %v1762_v17 = vadd.f32 %v1761_v16, %v1760_v15  ;;  %v1763_v19 = vpop.f32.mrb[6].mxu1 }
 0x138   :  { %v1764_v20 = vpop.f32.mrb[7].mxu1 }
 0x139   :  { %v1409_v26 = vadd.f32 %v1762_v17, %v302_v23 }
 0x155   :  { %v1782_v24 = vpop.f32.mrb[8].mxu1 }
 0x156   :  { %v1783_v25 = vpop.f32.mrb[9].mxu1 }
 0x157   :  { %v1784_v27 = vadd.f32 %v1783_v25, %v1782_v24  ;;  %v1785_v28 = vpop.f32.mrb[10].mxu1 }
 0x158   :  { %v1786_v29 = vpop.f32.mrb[11].mxu1 }
 0x159   :  { %v1449_v30 = vadd.f32 %v1784_v27, %v1409_v26 }
 0x175   :  { %v1804_v37 = vpop.f32.mrb[12].mxu1 }
 0x176   :  { %v1367_v36 = vpop.f32.mrb[0].mxu0  ;;  %v1805_v40 = vpop.f32.mrb[13].mxu1 }
 0x177   :  { %v1840_v38 = vadd.f32 %v1367_v36, %v1245_v34  ;;  %v1369_v39 = vpop.f32.mrb[1].mxu0  ;;  %v1806_v42 = vadd.f32 %v1805_v40, %v1804_v37  ;;  %v1807_v45 = vpop.f32.mrb[14].mxu1 }
 0x178   :  { %v1842_v41 = vadd.f32 %v1369_v39, %v1247_v35  ;;  %v1371_v44 = vpop.f32.mrb[2].mxu0  ;;  %v1808_v47 = vpop.f32.mrb[15].mxu1 }
 0x179   :  { %v1372_v46 = vpop.f32.mrb[3].mxu0  ;;  %v1489_v50 = vadd.f32 %v1806_v42, %v1449_v30 }
 0x17a   :  { %v1537_v48 = vcombine.low %v1840_v38, %v1842_v41 }
 0x17c   :  { %v1544_v55 = vrot.slane %v1537_v48, %v2265_v49 }
 0x195   :  { %v1528_v43 = vpop.f32.mrb[16].mxu1 }
 0x196   :  { %v1529_v51 = vadd.f32 %v1528_v43, %v1489_v50  ;;  %v1837_v52 = vpop.f32.mrb[17].mxu1 }
 0x197   :  { %v1531_v53 = vpop.f32.mrb[18].mxu1 }
 0x198   :  { %v1551_v56 = vrot.slane %v1529_v51, %v2265_v49  ;;  %v1838_v57 = vpop.f32.mrb[19].mxu1 }
 0x19a   :  { %v1552_v58 = vcombine.low %v1544_v55, %v1551_v56 }
 0x19c   :  { %1559 = vst.msk [vmem:[#allocation2] sm:$0x3f] %vm1558_vm7, %v1552_v58 }
 0x19d   :  { %2092 = shalt.err (!%p2089_p4)
}
 0x19e   :  { %s2093_s26 = scalar_lea.hbm %s2696_s3, 96 }
 0x19f   :  { %p2094_p5 = scmp.ne.s32.totalorder %s2696_s3, %s2093_s26  ;;  %p2097_p6 = scmp.lt.u32.totalorder %s2093_s26, %s2696_s3 }
 0x1a1   :  { %p2099_p7 = pnand %p2097_p6, %p2094_p5 }
 0x1a3   :  { %2102 = shalt.err (!%p2099_p7)
}
 0x1a4   :  { %1569 = dma.vmem_to_hbm [thread:$0]  %s1567_s22, 96, %s2696_s3, [#allocation3]  }
 0x1a5   :  { %2103 = dma.done.wait [#allocation3], 96  }
 0x1a6   :  { %2104 = vsyncadd [#allocation3], 4294967200 }
 0x1a7   :  { %1573 = vsyncpa [#allocation3], 1 }

</bundles_post_ra>
